<compile_context>
chip_gen: v7x
topology: tpu7x:2x2x1
jax: 0.10.0
libtpu: 0.0.40
codegen_flags: <defaults>
</compile_context>

<pallas_src>
import numpy as np
import jax
import jax.numpy as jnp
from jax import lax
from jax.experimental import pallas as pl
from jax.experimental.pallas import tpu as pltpu

BN_EPS = 1e-3        # spconv backbones: norm_fn = partial(BatchNorm1d, eps=1e-3, momentum=0.01)
KVOL = 27            # 3x3x3 submanifold kernel volume
TILE_N = 256         # rows (active voxels) per grid step (raise to 512 on v6e)
LANE = 128           # TPU lane width


def _round_up(x, m):
    return (x + m - 1) // m * m


# --------------------------------------------------------------------------- #
# Kernel A: fused feature add on a lane-dense folded [*, 128] view, bf16 out.
# --------------------------------------------------------------------------- #
def _fuse_add_kernel(f1_ref, f2_ref, x_ref):
    x_ref[...] = (f1_ref[...] + f2_ref[...]).astype(jnp.bfloat16)


# --------------------------------------------------------------------------- #
# Kernel B: one lane-dense GEMM [TILE_N, 27*Cin] x [27*Cin, Cout_pad] + bias
#           + per-tile BatchNorm partial sums (padded rows masked out).
# --------------------------------------------------------------------------- #
def _make_gemm_stats_kernel(n_valid):
    def kernel(g_ref, w_ref, b_ref, out_ref, stats_ref):
        # g_ref    : [TILE_N, 27*Cin] bf16 (streamed im2col block)
        # w_ref    : [27*Cin, Cout_pad] bf16, pinned
        # b_ref    : [1, Cout_pad] f32, pinned
        # out_ref  : [TILE_N, Cout_pad] f32  (pre-BN conv output tile)
        # stats_ref: [1, 2, Cout_pad] f32    (row 0 = sum, row 1 = sum of squares)
        acc = jnp.dot(g_ref[...], w_ref[...], preferred_element_type=jnp.float32)
        acc = acc + b_ref[...]
        out_ref[...] = acc

        # Per-tile BN partials; rows beyond the true N are excluded.
        # TODO(synk): for very large N / non-zero-mean activations, switch the
        # (sum, sumsq) partials to a Welford-style (count, mean, M2) combine.
        rows = pl.program_id(0) * TILE_N + lax.broadcasted_iota(jnp.int32, (TILE_N, 1), 0)
        masked = jnp.where(rows < n_valid, acc, 0.0)
        stats_ref[0, 0:1, :] = jnp.sum(masked, axis=0, keepdims=True)
        stats_ref[0, 1:2, :] = jnp.sum(masked * masked, axis=0, keepdims=True)

    return kernel


# --------------------------------------------------------------------------- #
# Kernel C: BN finalize (reduce partials once) -> per-channel scale / shift.
# --------------------------------------------------------------------------- #
def _make_finalize_kernel(n_valid):
    inv_n = 1.0 / float(n_valid)

    def kernel(stats_ref, gamma_ref, beta_ref, ss_ref):
        tot = jnp.sum(stats_ref[...], axis=0)              # [2, Cout_pad]
        mean = tot[0:1, :] * inv_n
        ex2 = tot[1:2, :] * inv_n
        var = jnp.maximum(ex2 - mean * mean, 0.0)
        scale = gamma_ref[...] * lax.rsqrt(var + BN_EPS)
        ss_ref[0:1, :] = scale
        ss_ref[1:2, :] = beta_ref[...] - mean * scale

    return kernel


# --------------------------------------------------------------------------- #
# Kernel D: y = relu(conv * scale + shift), pure streamed FMA.
# --------------------------------------------------------------------------- #
def _bn_relu_kernel(conv_ref, ss_ref, out_ref):
    out_ref[...] = jnp.maximum(conv_ref[...] * ss_ref[0:1, :] + ss_ref[1:2, :], 0.0)


# --------------------------------------------------------------------------- #
# Wrapper
# --------------------------------------------------------------------------- #
def spconv_fuse_add(f1, f2, nbr, w, bias, gamma, beta):
    """f1, f2: [N, Cin] f32 features of the two sparse tensors (same indices).
    nbr: [27, N] int32 rulebook (-1 = inactive neighbor).  w: [27, Cin, Cout].
    bias/gamma/beta: [1, Cout].  Returns [N, Cout] f32."""
    n, cin = f1.shape
    cout = w.shape[-1]
    assert (TILE_N * cin) % LANE == 0
    n_pad = _round_up(n + 1, TILE_N)          # guarantees >=1 all-zero sentinel row
    cout_pad = _round_up(cout, LANE)
    num_tiles = n_pad // TILE_N
    fold = TILE_N * cin // LANE               # folded rows per tile (lane-dense add)

    cp = pltpu.CompilerParams(dimension_semantics=("parallel",),
                              vmem_limit_bytes=32 * 1024 * 1024)

    # Padding / dtype prep (pure layout plumbing).
    f1p = jnp.pad(f1, ((0, n_pad - n), (0, 0))).reshape(num_tiles * fold, LANE)
    f2p = jnp.pad(f2, ((0, n_pad - n), (0, 0))).reshape(num_tiles * fold, LANE)
    w_flat = jnp.pad(w.reshape(KVOL * cin, cout),
                     ((0, 0), (0, cout_pad - cout))).astype(jnp.bfloat16)
    bias_p = jnp.pad(bias, ((0, 0), (0, cout_pad - cout)))
    gamma_p = jnp.pad(gamma, ((0, 0), (0, cout_pad - cout)), constant_values=1.0)
    beta_p = jnp.pad(beta, ((0, 0), (0, cout_pad - cout)))

    # 1) fused feature add, lane-dense folded blocks, bf16 output.
    xf = pl.pallas_call(
        _fuse_add_kernel,
        out_shape=jax.ShapeDtypeStruct((num_tiles * fold, LANE), jnp.bfloat16),
        grid=(num_tiles,),
        in_specs=[pl.BlockSpec((fold, LANE), lambda i: (i, 0)),
                  pl.BlockSpec((fold, LANE), lambda i: (i, 0))],
        out_specs=pl.BlockSpec((fold, LANE), lambda i: (i, 0)),
        compiler_params=cp,
    )(f1p, f2p).reshape(n_pad, cin)

    # 2) rulebook gather (im2col) via XLA gather on the bf16 table; -1 taps go
    #    to the all-zero sentinel row (index n).  Row layout is tap-major,
    #    channel-minor, matching w_flat's flattened contraction dim.
    # TODO(synk): optionally replace with an in-kernel DMA gather once a
    # tap-major, >=8-row-block gather is measured to beat the XLA gather.
    nbr_t = jnp.transpose(nbr.astype(jnp.int32))                 # [N, 27]
    nbr_t = jnp.where(nbr_t >= 0, nbr_t, n)                      # missing -> zero row
    nbr_t = jnp.pad(nbr_t, ((0, n_pad - n), (0, 0)), constant_values=n)
    g = jnp.take(xf, nbr_t, axis=0).reshape(n_pad, KVOL * cin)   # [N_pad, 27*Cin] bf16

    # 3) single GEMM per row tile + bias + per-tile BN partials.
    conv_out, stats = pl.pallas_call(
        _make_gemm_stats_kernel(n),
        out_shape=(jax.ShapeDtypeStruct((n_pad, cout_pad), jnp.float32),
                   jax.ShapeDtypeStruct((num_tiles, 2, cout_pad), jnp.float32)),
        grid=(num_tiles,),
        in_specs=[pl.BlockSpec((TILE_N, KVOL * cin), lambda i: (i, 0)),      # streamed
                  pl.BlockSpec((KVOL * cin, cout_pad), lambda i: (0, 0)),    # W pinned
                  pl.BlockSpec((1, cout_pad), lambda i: (0, 0))],            # bias pinned
        out_specs=(pl.BlockSpec((TILE_N, cout_pad), lambda i: (i, 0)),
                   pl.BlockSpec((1, 2, cout_pad), lambda i: (i, 0, 0))),
        compiler_params=cp,
    )(g, w_flat, bias_p)

    # 4) BN finalize -> per-channel scale/shift (single tiny program).
    ss = pl.pallas_call(
        _make_finalize_kernel(n),
        out_shape=jax.ShapeDtypeStruct((2, cout_pad), jnp.float32),
    )(stats, gamma_p, beta_p)

    # 5) FMA + ReLU, streamed over lane-dense tiles.
    out_pad = pl.pallas_call(
        _bn_relu_kernel,
        out_shape=jax.ShapeDtypeStruct((n_pad, cout_pad), jnp.float32),
        grid=(num_tiles,),
        in_specs=[pl.BlockSpec((TILE_N, cout_pad), lambda i: (i, 0)),
                  pl.BlockSpec((2, cout_pad), lambda i: (0, 0))],
        out_specs=pl.BlockSpec((TILE_N, cout_pad), lambda i: (i, 0)),
        compiler_params=cp,
    )(conv_out, ss)

    return out_pad[:n, :cout]


# --------------------------------------------------------------------------- #
# Host-side rulebook (index bookkeeping, like spconv's indice pairs).
# --------------------------------------------------------------------------- #
def build_neighbor_rulebook(indices, spatial_shape, n):
    """SubMConv3d(k=3, s=1, p=1): nbr[k, i] = row index of the active voxel at
    indices[i] + offset_k, or -1 if that site is inactive."""
    b_dim = int(indices[:, 0].max()) + 1
    dz, dy, dx = spatial_shape
    vol = -np.ones((b_dim, dz + 2, dy + 2, dx + 2), dtype=np.int32)  # pad=1 halo
    bi = indices[:, 0]
    zi = indices[:, 1] + 1
    yi = indices[:, 2] + 1
    xi = indices[:, 3] + 1
    vol[bi, zi, yi, xi] = np.arange(n, dtype=np.int32)
    nbr = np.empty((KVOL, n), dtype=np.int32)
    k = 0
    # TODO(synk): verify the tap<->offset ordering (conv vs correlation convention)
    # against spconv's own rulebook before reusing trained spconv weights bit-exact.
    for oz in (-1, 0, 1):
        for oy in (-1, 0, 1):
            for ox in (-1, 0, 1):
                nbr[k] = vol[bi, zi + oz, yi + oy, xi + ox]
                k += 1
    return nbr


def reference(f1, f2, nbr, w, bias, gamma, beta):
    x = (f1 + f2).astype(jnp.bfloat16)
    wb = w.astype(jnp.bfloat16)
    gathered = jnp.take(x, jnp.maximum(nbr, 0), axis=0)                 # [27, N, Cin]
    gathered = jnp.where((nbr >= 0)[:, :, None], gathered, 0).astype(jnp.bfloat16)
    acc = jnp.einsum("knc,kcd->nd", gathered, wb,
                     preferred_element_type=jnp.float32) + bias
    mean = acc.mean(0, keepdims=True)
    var = ((acc - mean) ** 2).mean(0, keepdims=True)
    y = (acc - mean) * lax.rsqrt(var + BN_EPS) * gamma + beta
    return jnp.maximum(y, 0.0)


if __name__ == "__main__":
    # Small, deterministic synthetic sparse tensor pair (shared indices).
    B, D, H, W = 2, 8, 8, 8
    CIN, COUT = 16, 32
    N_PER_BATCH = 48
    N = B * N_PER_BATCH

    key = jax.random.PRNGKey(0)
    kperm0, kperm1, kf1, kf2, kw, kb, kg, kbeta = jax.random.split(key, 8)

    rows = []
    for b, kp in zip(range(B), (kperm0, kperm1)):
        flat = np.asarray(jax.random.permutation(kp, D * H * W))[:N_PER_BATCH]
        z, rem = flat // (H * W), flat % (H * W)
        y, x = rem // W, rem % W
        rows.append(np.stack([np.full(N_PER_BATCH, b), z, y, x], axis=1))
    indices = np.concatenate(rows, axis=0).astype(np.int32)             # [N, 4]

    nbr = jnp.asarray(build_neighbor_rulebook(indices, (D, H, W), N))   # [27, N]

    f1 = jax.random.normal(kf1, (N, CIN), jnp.float32)
    f2 = jax.random.normal(kf2, (N, CIN), jnp.float32)
    w = 0.1 * jax.random.normal(kw, (KVOL, CIN, COUT), jnp.float32)     # 3x3x3 -> 27 taps
    bias = 0.1 * jax.random.normal(kb, (1, COUT), jnp.float32)
    gamma = 1.0 + 0.1 * jax.random.normal(kg, (1, COUT), jnp.float32)
    beta = 0.1 * jax.random.normal(kbeta, (1, COUT), jnp.float32)

    out = spconv_fuse_add(f1, f2, nbr, w, bias, gamma, beta)
    out = jax.block_until_ready(out)

    ref = jax.block_until_ready(reference(f1, f2, nbr, w, bias, gamma, beta))
    np.testing.assert_allclose(np.asarray(out), np.asarray(ref), rtol=2e-3, atol=2e-3)

    print("KERNEL_OK")
</pallas_src>

<mosaic_0001>
module attributes {stable_mosaic.version = 11 : i64} {
  func.func @_fuse_add_kernel(%arg0: i32, %arg1: memref<32x128xf32, #tpu.memory_space<vmem>>, %arg2: memref<32x128xf32, #tpu.memory_space<vmem>>, %arg3: memref<32x128xbf16, #tpu.memory_space<vmem>>) attributes {dimension_semantics = [#tpu.dimension_semantics<parallel>], iteration_bounds = array<i64: 1>, scalar_prefetch = 0 : i64, scratch_operands = 0 : i64, tpu.core_type = #tpu.core_type<tc>, window_params = [{transform_indices = @transform_0, window_bounds = array<i64: 32, 128>}, {transform_indices = @transform_1, window_bounds = array<i64: 32, 128>}, {transform_indices = @transform_2, window_bounds = array<i64: 32, 128>}]} {
    %c0 = arith.constant 0 : index
    %c0_0 = arith.constant 0 : index
    %0 = vector.load %arg1[%c0, %c0_0] : memref<32x128xf32, #tpu.memory_space<vmem>>, vector<32x128xf32>
    %c0_1 = arith.constant 0 : index
    %c0_2 = arith.constant 0 : index
    %1 = vector.load %arg2[%c0_1, %c0_2] : memref<32x128xf32, #tpu.memory_space<vmem>>, vector<32x128xf32>
    %2 = arith.addf %0, %1 : vector<32x128xf32>
    %3 = arith.truncf %2 : vector<32x128xf32> to vector<32x128xbf16>
    %c0_3 = arith.constant 0 : index
    %c0_4 = arith.constant 0 : index
    %4 = vector.load %arg3[%c0_3, %c0_4] : memref<32x128xbf16, #tpu.memory_space<vmem>>, vector<32x128xbf16>
    tpu.vector_store %arg3[%c0_3, %c0_4], %3 {strides = array<i32>} : memref<32x128xbf16, #tpu.memory_space<vmem>>, vector<32x128xbf16>,
    return
  }
  func.func @transform_0(%arg0: i32) -> (i32, i32) {
    %c0_i32 = arith.constant 0 : i32
    %c0_i32_0 = arith.constant 0 : i32
    return %arg0, %c0_i32 : i32, i32
  }
  func.func @transform_1(%arg0: i32) -> (i32, i32) {
    %c0_i32 = arith.constant 0 : i32
    %c0_i32_0 = arith.constant 0 : i32
    return %arg0, %c0_i32 : i32, i32
  }
  func.func @transform_2(%arg0: i32) -> (i32, i32) {
    %c0_i32 = arith.constant 0 : i32
    %c0_i32_0 = arith.constant 0 : i32
    return %arg0, %c0_i32 : i32, i32
  }
}

</mosaic_0001>

<bundles_post_ra>
// kernel: tpu_custom_call.1
= control target key start
LH: loop header
LB: loop body
LE: loop exit
PB: predicated region body
PF: predicated region fallthrough
CT: control target
= control target key end

     0   :  { %7 = vsyncpa [#allocation3], 0  ;;  %s246_s0 = inlined_call_operand.hbm [shape: f32[32,128], index: 0, kind: input, shape index: {}]   ;;  %s247_s1 = inlined_call_operand.hbm [shape: f32[32,128], index: 1, kind: input, shape index: {}]   ;;  %s248_s2 = inlined_call_operand.hbm [shape: bf16[32,128], index: 2, kind: output, shape index: {}]  }
   0x1   :  { %8 = vsyncpa [#allocation6], 0 }
   0x2   :  { %9 = vsyncpa [#allocation4], 0  ;;  %s188_s9 = smov [#allocation2]   ;;  %s116_s13 = scalar_lea.hbm %s246_s0, 512 }
   0x3   :  { %s15_s10 = sshll.u32 %s188_s9, 4  ;;  %p117_p0 = scmp.ne.s32.totalorder %s246_s0, %s116_s13  ;;  %s16_s10 = int_to_ptr.vmem [resolvable:$true] %s15_s10 }
   0x4   :  { %p120_p1 = scmp.lt.u32.totalorder %s116_s13, %s246_s0 }
   0x6   :  { %p122_p2 = pnand %p120_p1, %p117_p0 }
   0x8   :  { %125 = shalt.err (!%p122_p2)
}
   0x9   :  { %s126_s18 = scalar_lea.vmem %s16_s10, 512  ;;  %p131_p4 = scmp.lt.s32.totalorder %s16_s10, %s16_s10 }
   0xa   :  { %p127_p3 = scmp.ne.s32.totalorder %s16_s10, %s126_s18  ;;  %p132_p5 = scmp.lt.s32.totalorder %s126_s18, %s126_s18 }
   0xc   :  { %p133_p6 = por %p132_p5, %p131_p4 }
   0xe   :  { %p134_p7 = pnand %p133_p6, %p127_p3 }
  0x10   :  { %137 = shalt.err (!%p134_p7)
}
  0x11   :  { %s189_s19 = smov 128   ;;  %s190_s20 = smov 8  }
  0x12   :  { %21 = dma.hbm_to_vmem [thread:$0]  %s246_s0, 512, %s16_s10, [#allocation3], %s189_s19, %s189_s19, %s190_s20  }
  0x13   :  { %s191_s23 = smov [#allocation5]   ;;  %s138_s27 = scalar_lea.hbm %s247_s1, 512 }
  0x14   :  { %s27_s24 = sshll.u32 %s191_s23, 4  ;;  %p139_p8 = scmp.ne.s32.totalorder %s247_s1, %s138_s27  ;;  %s28_s24 = int_to_ptr.vmem [resolvable:$true] %s27_s24 }
  0x15   :  { %p142_p9 = scmp.lt.u32.totalorder %s138_s27, %s247_s1 }
  0x17   :  { %p144_p10 = pnand %p142_p9, %p139_p8 }
  0x19   :  { %147 = shalt.err (!%p144_p10)
}
  0x1a   :  { %s148_s4 = scalar_lea.vmem %s28_s24, 512  ;;  %p153_p12 = scmp.lt.s32.totalorder %s28_s24, %s28_s24 }
  0x1b   :  { %p149_p11 = scmp.ne.s32.totalorder %s28_s24, %s148_s4  ;;  %p154_p13 = scmp.lt.s32.totalorder %s148_s4, %s148_s4 }
  0x1d   :  { %p155_p0 = por %p154_p13, %p153_p12 }
  0x1f   :  { %p156_p1 = pnand %p155_p0, %p149_p11 }
  0x21   :  { %159 = shalt.err (!%p156_p1)
}
  0x22   :  { %33 = dma.hbm_to_vmem [thread:$0]  %s247_s1, 512, %s28_s24, [#allocation6], %s189_s19, %s189_s19, %s190_s20  }
  0x23   :  { %182 = dma.done.wait [#allocation3], 512  }
  0x24   :  { %183 = vsyncadd [#allocation3], 4294966784 }
  0x25   :  { %184 = dma.done.wait [#allocation6], 512  }
  0x26   :  { %185 = vsyncadd [#allocation6], 4294966784  ;;  %v40_v0 = vld [vmem:[#allocation2] sm:$0xff]  ;;  %v41_v1 = vld [vmem:[#allocation2 + $0x8] sm:$0xff]  ;;  %s192_s6 = smov [#allocation7]  }
  0x27   :  { %v44_v2 = vld [vmem:[#allocation5] sm:$0xff]  ;;  %v45_v3 = vld [vmem:[#allocation5 + $0x8] sm:$0xff]  ;;  %v42_v5 = vld [vmem:[#allocation2 + $0x10] sm:$0xff]  ;;  %s77_s7 = sshll.u32 %s192_s6, 4  ;;  %s78_s7 = int_to_ptr.vmem [resolvable:$true] %s77_s7 }
  0x28   :  { %v48_v4 = vadd.f32 %v44_v2, %v40_v0  ;;  %v43_v6 = vld [vmem:[#allocation2 + $0x18] sm:$0xff]  ;;  %v49_v7 = vadd.f32 %v45_v3, %v41_v1  ;;  %v46_v8 = vld [vmem:[#allocation5 + $0x10] sm:$0xff]  ;;  %s160_s1 = scalar_lea.vmem %s78_s7, 256  ;;  %p165_p3 = scmp.lt.s32.totalorder %s78_s7, %s78_s7 }
  0x29   :  { %v47_v9 = vld [vmem:[#allocation5 + $0x18] sm:$0xff]  ;;  %v50_v10 = vadd.f32 %v46_v8, %v42_v5  ;;  %p161_p2 = scmp.ne.s32.totalorder %s78_s7, %s160_s1  ;;  %p166_p4 = scmp.lt.s32.totalorder %s160_s1, %s160_s1 }
  0x2a   :  { %v51_v11 = vadd.f32 %v47_v9, %v43_v6  ;;  %v101_v12 = vpack.c.bf16 %v49_v7, %v48_v4 }
  0x2b   :  { %p167_p5 = por %p166_p4, %p165_p3 }
  0x2c   :  { %v106_v13 = vpack.c.bf16 %v51_v11, %v50_v10  ;;  %102 = vst [vmem:[#allocation7] sm:$0xff] %v101_v12  }
  0x2d   :  { %p168_p6 = pnand %p167_p5, %p161_p2 }
  0x2e   :  { %108 = vst [vmem:[#allocation7 + $0x8] sm:$0xff] %v106_v13  }
  0x2f   :  { %171 = shalt.err (!%p168_p6)
}
  0x30   :  { %s172_s10 = scalar_lea.hbm %s248_s2, 256 }
  0x31   :  { %p173_p7 = scmp.ne.s32.totalorder %s248_s2, %s172_s10  ;;  %p176_p8 = scmp.lt.u32.totalorder %s172_s10, %s248_s2 }
  0x33   :  { %p178_p9 = pnand %p176_p8, %p173_p7 }
  0x35   :  { %181 = shalt.err (!%p178_p9)
}
  0x36   :  { %s193_s15 = smov 64   ;;  %s194_s16 = smov 4  }
  0x37   :  { %83 = dma.vmem_to_hbm [thread:$0]  %s78_s7, 256, %s248_s2, [#allocation4], %s193_s15, %s193_s15, %s194_s16  }
  0x38   :  { %186 = dma.done.wait [#allocation4], 256  }
  0x39   :  { %187 = vsyncadd [#allocation4], 4294967040 }
  0x3a   :  { %87 = vsyncpa [#allocation3], 1 }
  0x3b   :  { %88 = vsyncpa [#allocation6], 1 }
  0x3c   :  { %89 = vsyncpa [#allocation4], 1 }

</bundles_post_ra>
